<compile_context>
chip_gen: v5e
topology: v5e:2x2
jax: 0.10.0
libtpu: 0.0.40
codegen_flags: <defaults>
</compile_context>

<pallas_src>
import functools

import jax
import jax.numpy as jnp
from jax import lax
from jax.experimental import pallas as pl
from jax.experimental.pallas import tpu as pltpu


def _channel_attention_kernel(wc_ref, ctx_ref, w_ref, out_ref, attn_ref, *,
                              group, s2, seq_l):
    # wc_ref  : (gpt, idf, group*s2)    weightedContext, group-packed (lane-dense)
    # ctx_ref : (gpt, cdf, group*seq_l) context, group-packed (lane-dense)
    # w_ref   : (s2, cdf)               conv1x1(cdf -> s2) weight (no bias)
    # out_ref : (gpt, idf, group*s2)    weightedContext_T, group-packed
    # attn_ref: (gpt, idf, group*seq_l) softmaxed attention, group-packed,
    #                                   un-transposed (the wrapper produces the
    #                                   PyTorch (B, L, idf) attn_c)
    w = w_ref[...]                       # (s2, cdf), loaded once per step
    gpt = wc_ref.shape[0]                # static: groups per grid step

    def per_group(g):
        ctx_g = ctx_ref[g]               # (cdf, group*seq_l)  dynamic leading index
        wc_g = wc_ref[g]                 # (idf, group*s2)

        # conv1x1 folded across the whole group: one lane-dense MXU matmul.
        #   src_g[s, j*seq_l + l] == sourceC[b_j, s, l]
        src_g = jnp.dot(w, ctx_g, preferred_element_type=jnp.float32)

        # Static unroll over the `group` batch elements packed along lanes;
        # every slice below has a static offset and size.
        for j in range(group):
            wc_b = wc_g[:, j * s2:(j + 1) * s2]            # (idf, s2)
            src_b = src_g[:, j * seq_l:(j + 1) * seq_l]    # (s2, seq_l)

            # attn = weightedContext @ sourceC; softmax over L (PyTorch views
            # (B*idf, L) before the legacy nn.Softmax(), i.e. softmax dim == L).
            logits = jnp.dot(wc_b, src_b, preferred_element_type=jnp.float32)
            logits = logits - jnp.max(logits, axis=-1, keepdims=True)
            e = jnp.exp(logits)
            attn_b = e / jnp.sum(e, axis=-1, keepdims=True)  # exact: rows sum to 1

            # out = attn @ sourceC^T via dot_general contracting L on both
            # operands -> no explicit transpose materialized in-kernel.
            out_b = lax.dot_general(
                attn_b, src_b,
                dimension_numbers=(((1,), (1,)), ((), ())),
                preferred_element_type=jnp.float32,
            )                                              # (idf, s2)

            attn_ref[g, :, j * seq_l:(j + 1) * seq_l] = attn_b.astype(attn_ref.dtype)
            out_ref[g, :, j * s2:(j + 1) * s2] = out_b.astype(out_ref.dtype)

    if gpt <= 4:
        # Tiny tiles (small B): keep everything fully static.
        for g in range(gpt):
            per_group(g)
    else:
        # Large tiles: fori_loop keeps the instruction stream short; the LLO
        # scheduler still pipelines MXU/EUP/XLU work across the 16-wide unroll.
        def body(g, carry):
            per_group(g)
            return carry
        lax.fori_loop(0, gpt, body, 0)


def _tile_bytes(shape, itemsize=4):
    """Bytes actually moved for an f32 array in (8,128)-tiled HBM/VMEM layout."""
    s = list(shape)
    s[-1] = -(-s[-1] // 128) * 128
    s[-2] = -(-s[-2] // 8) * 8
    n = 1
    for d in s:
        n *= d
    return n * itemsize


def channel_attention(weighted_context, context, conv_w, ih, iw, *,
                      block_batch=256, group=16):
    """Pallas implementation of ChannelAttention.forward.

    Args:
      weighted_context: (B, idf, S2) float32, S2 == ih*iw
      context:          (B, cdf, L)  float32
      conv_w:           (S2, cdf)    float32 -- conv1x1(cdf, size*size) weight
      block_batch:      ~batch elements processed per grid step (tuned knob).
      group:            batch elements packed per lane-group (static unroll).
    Returns:
      (weightedContext_T, attn_c) with shapes (B, idf, ih, iw) and (B, L, idf).
    """
    B, idf, S2 = weighted_context.shape
    Bc, cdf, L = context.shape
    assert Bc == B
    assert S2 == ih * iw
    assert conv_w.shape == (S2, cdf)

    # ---- group size G: prefer a divisor of B (no jnp.pad copies); only pad
    # when the best divisor would leave the packed lane dims tiny.
    g_req = max(1, min(group, B))
    G = g_req
    while B % G:
        G -= 1
    if G < (g_req + 1) // 2:
        G = g_req
    pad = (-B) % G
    Bp = B + pad
    n_groups = Bp // G

    # ---- groups per grid step: amortize the ~0.35us/step pipeline overhead,
    # but keep >= 2 grid steps when possible so the "parallel" batch axis can
    # shard across v7x's two TensorCores.
    gpt = max(1, min(block_batch // G, n_groups))
    if n_groups >= 2:
        gpt = max(1, min(gpt, n_groups // 2))
    while n_groups % gpt:
        gpt -= 1
    n_tiles = n_groups // gpt

    if pad:
        weighted_context = jnp.pad(weighted_context, ((0, pad), (0, 0), (0, 0)))
        context = jnp.pad(context, ((0, pad), (0, 0), (0, 0)))

    # ---- group-pack (wrapper-side layout plumbing): batch moves onto the lane
    # axis so every HBM block the kernel touches is lane-dense
    # (minor dims G*S2 / G*L instead of 16 / 8).
    wc_p = (weighted_context.reshape(n_groups, G, idf, S2)
            .transpose(0, 2, 1, 3).reshape(n_groups, idf, G * S2))
    ctx_p = (context.reshape(n_groups, G, cdf, L)
             .transpose(0, 2, 1, 3).reshape(n_groups, cdf, G * L))

    kernel = functools.partial(_channel_attention_kernel,
                               group=G, s2=S2, seq_l=L)

    flops = 2 * Bp * (S2 * cdf * L + idf * S2 * L + idf * L * S2)
    transcendentals = Bp * idf * L                     # exp
    bytes_accessed = (_tile_bytes((n_groups, idf, G * S2)) * 2   # wc in + out
                      + _tile_bytes((n_groups, cdf, G * L))      # ctx in
                      + _tile_bytes((n_groups, idf, G * L))      # attn out
                      + _tile_bytes((S2, cdf)))                  # weight, fetched once

    out_p, attn_p = pl.pallas_call(
        kernel,
        out_shape=(
            jax.ShapeDtypeStruct((n_groups, idf, G * S2), jnp.float32),
            jax.ShapeDtypeStruct((n_groups, idf, G * L), jnp.float32),
        ),
        grid=(n_tiles,),
        in_specs=[
            pl.BlockSpec((gpt, idf, G * S2), lambda t: (t, 0, 0)),
            pl.BlockSpec((gpt, cdf, G * L), lambda t: (t, 0, 0)),
            pl.BlockSpec((S2, cdf), lambda t: (0, 0)),
        ],
        out_specs=(
            pl.BlockSpec((gpt, idf, G * S2), lambda t: (t, 0, 0)),
            pl.BlockSpec((gpt, idf, G * L), lambda t: (t, 0, 0)),
        ),
        compiler_params=pltpu.CompilerParams(
            dimension_semantics=("parallel",),    # shards steps across v7x's 2 TCs
        ),
        cost_estimate=pl.CostEstimate(
            flops=flops,
            transcendentals=transcendentals,
            bytes_accessed=bytes_accessed,
        ),
    )(wc_p, ctx_p, conv_w)

    # ---- unpack back to the PyTorch layouts (wrapper-side only).
    out = (out_p.reshape(n_groups, idf, G, S2).transpose(0, 2, 1, 3)
           .reshape(Bp, idf, S2)[:B].reshape(B, idf, ih, iw))
    attn = (attn_p.reshape(n_groups, idf, G, L).transpose(0, 2, 1, 3)
            .reshape(Bp, idf, L)[:B])
    attn_c = jnp.transpose(attn, (0, 2, 1))            # (B, L, idf)
    return out, attn_c


def _reference(weighted_context, context, conv_w, ih, iw):
    # Pure-JAX reference mirroring the PyTorch code.
    B, idf, S2 = weighted_context.shape
    source_c = jnp.einsum("sc,bcl->bsl", conv_w, context)          # (B, S2, L)
    attn = jnp.einsum("bis,bsl->bil", weighted_context, source_c)  # (B, idf, L)
    attn = jax.nn.softmax(attn, axis=-1)
    attn_c = jnp.transpose(attn, (0, 2, 1))                        # (B, L, idf)
    wct = jnp.einsum("bsl,bli->bsi", source_c, attn_c)             # (B, S2, idf)
    wct = jnp.transpose(wct, (0, 2, 1)).reshape(B, idf, ih, iw)
    return wct, attn_c


def _run_case(B, idf, cdf, size, L, seed):
    ih = iw = size
    S2 = size * size
    key = jax.random.PRNGKey(seed)
    k1, k2, k3 = jax.random.split(key, 3)
    weighted_context = jax.random.normal(k1, (B, idf, S2), jnp.float32)
    context = jax.random.normal(k2, (B, cdf, L), jnp.float32)
    # Conv2d(cdf, size*size, 1, bias=False) weight is (S2, cdf, 1, 1) -> (S2, cdf).
    conv_w = jax.random.normal(k3, (S2, cdf), jnp.float32) * 0.1

    out, attn_c = channel_attention(weighted_context, context, conv_w, ih, iw)
    out = jax.block_until_ready(out)
    attn_c = jax.block_until_ready(attn_c)

    ref_out, ref_attn = _reference(weighted_context, context, conv_w, ih, iw)
    assert out.shape == (B, idf, ih, iw)
    assert attn_c.shape == (B, L, idf)
    # Softmax normalization is exact now; tolerance only covers MXU f32 matmul
    # pass differences between the kernel and the XLA reference.
    assert jnp.allclose(out, ref_out, atol=2e-3, rtol=2e-3)
    assert jnp.allclose(attn_c, ref_attn, atol=2e-3, rtol=2e-3)


if __name__ == "__main__":
    # Small shapes consistent with the module: size=4 => S2=16, ih=iw=4.
    _run_case(B=2, idf=16, cdf=8, size=4, L=8, seed=0)
    # Larger batch: exercises the lane-dense packed path (G=16, fori_loop over
    # groups, grid of 2 "parallel" steps).
    _run_case(B=160, idf=16, cdf=8, size=4, L=8, seed=1)
    print("KERNEL_OK")
</pallas_src>

<mosaic_0001>
module attributes {stable_mosaic.version = 11 : i64} {
  func.func @_channel_attention_kernel(%arg0: i32, %arg1: memref<1x16x32xf32, #tpu.memory_space<vmem>>, %arg2: memref<1x8x16xf32, #tpu.memory_space<vmem>>, %arg3: memref<16x8xf32, #tpu.memory_space<vmem>>, %arg4: memref<1x16x32xf32, #tpu.memory_space<vmem>>, %arg5: memref<1x16x16xf32, #tpu.memory_space<vmem>>) attributes {dimension_semantics = [#tpu.dimension_semantics<parallel>], iteration_bounds = array<i64: 1>, scalar_prefetch = 0 : i64, scratch_operands = 0 : i64, tpu.core_type = #tpu.core_type<tc>, window_params = [{transform_indices = @transform_0, window_bounds = array<i64: 1, 16, 32>}, {transform_indices = @transform_1, window_bounds = array<i64: 1, 8, 16>}, {pipeline_mode = #tpu.pipeline_mode<synchronous>, transform_indices = @transform_2, window_bounds = array<i64: 16, 8>}, {transform_indices = @transform_3, window_bounds = array<i64: 1, 16, 32>}, {transform_indices = @transform_4, window_bounds = array<i64: 1, 16, 16>}]} {
    %c0 = arith.constant 0 : index
    %c0_0 = arith.constant 0 : index
    %0 = vector.load %arg3[%c0, %c0_0] : memref<16x8xf32, #tpu.memory_space<vmem>>, vector<16x8xf32>
    %c0_1 = arith.constant 0 : index
    %c0_2 = arith.constant 0 : index
    %c0_3 = arith.constant 0 : index
    %1 = vector.load %arg2[%c0_1, %c0_2, %c0_3] : memref<1x8x16xf32, #tpu.memory_space<vmem>>, vector<1x8x16xf32>
    %2 = vector.shape_cast %1 : vector<1x8x16xf32> to vector<8x16xf32>
    %c0_4 = arith.constant 0 : index
    %c0_5 = arith.constant 0 : index
    %c0_6 = arith.constant 0 : index
    %3 = vector.load %arg1[%c0_4, %c0_5, %c0_6] : memref<1x16x32xf32, #tpu.memory_space<vmem>>, vector<1x16x32xf32>
    %4 = vector.shape_cast %3 : vector<1x16x32xf32> to vector<16x32xf32>
    %cst = arith.constant dense<0.000000e+00> : vector<16x16xf32>
    %5 = tpu.matmul %0, %2, %cst {dimension_numbers = #tpu.dot_dimension_numbers<[1], [0], [0], [1], [0, 0, 1, 1], [], []>} : vector<16x8xf32>, vector<8x16xf32>, vector<16x16xf32> -> vector<16x16xf32>
    %6 = vector.extract_strided_slice %4 {offsets = [0, 0], sizes = [16, 16], strides = [1, 1]} : vector<16x32xf32> to vector<16x16xf32>
    %7 = vector.extract_strided_slice %5 {offsets = [0, 0], sizes = [16, 8], strides = [1, 1]} : vector<16x16xf32> to vector<16x8xf32>
    %cst_7 = arith.constant dense<0.000000e+00> : vector<16x8xf32>
    %8 = tpu.matmul %6, %7, %cst_7 {dimension_numbers = #tpu.dot_dimension_numbers<[1], [0], [0], [1], [0, 0, 1, 1], [], []>} : vector<16x16xf32>, vector<16x8xf32>, vector<16x8xf32> -> vector<16x8xf32>
    %cst_8 = arith.constant dense<0xFF800000> : vector<16xf32>
    %9 = vector.multi_reduction <maximumf>, %8, %cst_8 [1] : vector<16x8xf32> to vector<16xf32>
    %10 = vector.shape_cast %9 : vector<16xf32> to vector<16x1xf32>
    %11 = vector.broadcast %10 : vector<16x1xf32> to vector<16x8xf32>
    %12 = arith.subf %8, %11 : vector<16x8xf32>
    %13 = math.exp %12 : vector<16x8xf32>
    %cst_9 = arith.constant dense<0.000000e+00> : vector<16xf32>
    %14 = vector.multi_reduction <add>, %13, %cst_9 [1] : vector<16x8xf32> to vector<16xf32>
    %15 = vector.shape_cast %14 : vector<16xf32> to vector<16x1xf32>
    %16 = vector.broadcast %15 : vector<16x1xf32> to vector<16x8xf32>
    %17 = arith.divf %13, %16 : vector<16x8xf32>
    %cst_10 = arith.constant dense<0.000000e+00> : vector<16x16xf32>
    %18 = tpu.matmul %17, %7, %cst_10 {dimension_numbers = #tpu.dot_dimension_numbers<[1], [1], [0], [0], [0, 0, 1, 0], [], []>} : vector<16x8xf32>, vector<16x8xf32>, vector<16x16xf32> -> vector<16x16xf32>
    %c0_11 = arith.constant 0 : index
    %c0_12 = arith.constant 0 : index
    %c0_13 = arith.constant 0 : index
    %19 = vector.load %arg5[%c0_11, %c0_12, %c0_13] : memref<1x16x16xf32, #tpu.memory_space<vmem>>, vector<1x16x8xf32>
    %20 = vector.shape_cast %19 : vector<1x16x8xf32> to vector<16x8xf32>
    %21 = vector.shape_cast %17 : vector<16x8xf32> to vector<1x16x8xf32>
    tpu.vector_store %arg5[%c0_11, %c0_12, %c0_13], %21 {strides = array<i32>} : memref<1x16x16xf32, #tpu.memory_space<vmem>>, vector<1x16x8xf32>,
    %c0_14 = arith.constant 0 : index
    %c0_15 = arith.constant 0 : index
    %c0_16 = arith.constant 0 : index
    %22 = vector.load %arg4[%c0_14, %c0_15, %c0_16] : memref<1x16x32xf32, #tpu.memory_space<vmem>>, vector<1x16x16xf32>
    %23 = vector.shape_cast %22 : vector<1x16x16xf32> to vector<16x16xf32>
    %24 = vector.shape_cast %18 : vector<16x16xf32> to vector<1x16x16xf32>
    tpu.vector_store %arg4[%c0_14, %c0_15, %c0_16], %24 {strides = array<i32>} : memref<1x16x32xf32, #tpu.memory_space<vmem>>, vector<1x16x16xf32>,
    %25 = vector.extract_strided_slice %4 {offsets = [0, 16], sizes = [16, 16], strides = [1, 1]} : vector<16x32xf32> to vector<16x16xf32>
    %26 = vector.extract_strided_slice %5 {offsets = [0, 8], sizes = [16, 8], strides = [1, 1]} : vector<16x16xf32> to vector<16x8xf32>
    %cst_17 = arith.constant dense<0.000000e+00> : vector<16x8xf32>
    %27 = tpu.matmul %25, %26, %cst_17 {dimension_numbers = #tpu.dot_dimension_numbers<[1], [0], [0], [1], [0, 0, 1, 1], [], []>} : vector<16x16xf32>, vector<16x8xf32>, vector<16x8xf32> -> vector<16x8xf32>
    %cst_18 = arith.constant dense<0xFF800000> : vector<16xf32>
    %28 = vector.multi_reduction <maximumf>, %27, %cst_18 [1] : vector<16x8xf32> to vector<16xf32>
    %29 = vector.shape_cast %28 : vector<16xf32> to vector<16x1xf32>
    %30 = vector.broadcast %29 : vector<16x1xf32> to vector<16x8xf32>
    %31 = arith.subf %27, %30 : vector<16x8xf32>
    %32 = math.exp %31 : vector<16x8xf32>
    %cst_19 = arith.constant dense<0.000000e+00> : vector<16xf32>
    %33 = vector.multi_reduction <add>, %32, %cst_19 [1] : vector<16x8xf32> to vector<16xf32>
    %34 = vector.shape_cast %33 : vector<16xf32> to vector<16x1xf32>
    %35 = vector.broadcast %34 : vector<16x1xf32> to vector<16x8xf32>
    %36 = arith.divf %32, %35 : vector<16x8xf32>
    %cst_20 = arith.constant dense<0.000000e+00> : vector<16x16xf32>
    %37 = tpu.matmul %36, %26, %cst_20 {dimension_numbers = #tpu.dot_dimension_numbers<[1], [1], [0], [0], [0, 0, 1, 0], [], []>} : vector<16x8xf32>, vector<16x8xf32>, vector<16x16xf32> -> vector<16x16xf32>
    %c0_21 = arith.constant 0 : index
    %c0_22 = arith.constant 0 : index
    %c8 = arith.constant 8 : index
    %38 = vector.load %arg5[%c0_21, %c0_22, %c8] : memref<1x16x16xf32, #tpu.memory_space<vmem>>, vector<1x16x8xf32>
    %39 = vector.shape_cast %38 : vector<1x16x8xf32> to vector<16x8xf32>
    %40 = vector.shape_cast %36 : vector<16x8xf32> to vector<1x16x8xf32>
    tpu.vector_store %arg5[%c0_21, %c0_22, %c8], %40 {strides = array<i32>} : memref<1x16x16xf32, #tpu.memory_space<vmem>>, vector<1x16x8xf32>,
    %c0_23 = arith.constant 0 : index
    %c0_24 = arith.constant 0 : index
    %c16 = arith.constant 16 : index
    %41 = vector.load %arg4[%c0_23, %c0_24, %c16] : memref<1x16x32xf32, #tpu.memory_space<vmem>>, vector<1x16x16xf32>
    %42 = vector.shape_cast %41 : vector<1x16x16xf32> to vector<16x16xf32>
    %43 = vector.shape_cast %37 : vector<16x16xf32> to vector<1x16x16xf32>
    tpu.vector_store %arg4[%c0_23, %c0_24, %c16], %43 {strides = array<i32>} : memref<1x16x32xf32, #tpu.memory_space<vmem>>, vector<1x16x16xf32>,
    return
  }
  func.func @transform_0(%arg0: i32) -> (i32, i32, i32) {
    %c0_i32 = arith.constant 0 : i32
    %c0_i32_0 = arith.constant 0 : i32
    %c0_i32_1 = arith.constant 0 : i32
    return %arg0, %c0_i32, %c0_i32_0 : i32, i32, i32
  }
  func.func @transform_1(%arg0: i32) -> (i32, i32, i32) {
    %c0_i32 = arith.constant 0 : i32
    %c0_i32_0 = arith.constant 0 : i32
    %c0_i32_1 = arith.constant 0 : i32
    return %arg0, %c0_i32, %c0_i32_0 : i32, i32, i32
  }
  func.func @transform_2(%arg0: i32) -> (i32, i32) {
    %c0_i32 = arith.constant 0 : i32
    %c0_i32_0 = arith.constant 0 : i32
    %c0_i32_1 = arith.constant 0 : i32
    return %c0_i32, %c0_i32_0 : i32, i32
  }
  func.func @transform_3(%arg0: i32) -> (i32, i32, i32) {
    %c0_i32 = arith.constant 0 : i32
    %c0_i32_0 = arith.constant 0 : i32
    %c0_i32_1 = arith.constant 0 : i32
    return %arg0, %c0_i32, %c0_i32_0 : i32, i32, i32
  }
  func.func @transform_4(%arg0: i32) -> (i32, i32, i32) {
    %c0_i32 = arith.constant 0 : i32
    %c0_i32_0 = arith.constant 0 : i32
    %c0_i32_1 = arith.constant 0 : i32
    return %arg0, %c0_i32, %c0_i32_0 : i32, i32, i32
  }
}

</mosaic_0001>

<bundles_post_ra>
// kernel: tpu_custom_call.1
= control target key start
LH: loop header
LB: loop body
LE: loop exit
PB: predicated region body
PF: predicated region fallthrough
CT: control target
= control target key end

     0   :  { %10 = vsyncpa [#allocation3], 0  ;;  %vm23_vm0 = vcmask 64512   ;;  %s525_s0 = inlined_call_operand.vmem [shape: f32[1,16,32], index: 0, kind: input, shape index: {}]   ;;  %s526_s1 = inlined_call_operand.vmem [shape: f32[1,8,16], index: 1, kind: input, shape index: {}]   ;;  %s527_s2 = inlined_call_operand.vmem [shape: f32[16,8], index: 2, kind: input, shape index: {}]   ;;  %s528_s3 = inlined_call_operand.hbm [shape: f32[1,16,32], index: 3, kind: output, shape index: {0}]   ;;  %s529_s4 = inlined_call_operand.hbm [shape: f32[1,16,16], index: 4, kind: output, shape index: {1}]  }
   0x1   :  { %v20_v0 = vld [vmem:[%s526_s1] sm:$0xff]  ;;  %v19_v1 = vld [vmem:[%s527_s2 + $0x8] sm:$0xff] }
   0x2   :  { %v18_v2 = vld [vmem:[%s527_s2] sm:$0xff]  ;;  %358 = vmatpush.msra.mxu1 %v20_v0  ;;  %45 = vmatpush.msra.mxu0 %v20_v0 }
   0x3   :  { %11 = vsyncpa [#allocation5], 0  ;;  %345 = vmatmul.msk.f32.vlgmr.msra.gmra.mxu1 %vm23_vm0, %v19_v1  ;;  %344 = vmatmul.msk.f32.vlgmr.msra.gmra.mxu0 %vm23_vm0, %v18_v2  ;;  %v21_v3 = vld [vmem:[%s525_s0] sm:$0xff]  ;;  %s434_s1 = smov 112   ;;  %v22_v4 = vld [vmem:[%s525_s0 + $0x8] sm:$0xff]  ;;  %s435_s2 = smov 120  }
   0x4   :  { %170 = vrot.lane.b32.xlu1 %v21_v3, %s434_s1  ;;  %vm53_vm1 = vcmask 130048   ;;  %s436_s0 = smov 8   ;;  %s437_s25 = smov [#allocation4]  }
   0x5   :  { %s325_s26 = sshll.u32 %s437_s25, 4  ;;  %s327_s29 = sshll.u32 %s529_s4, 4  ;;  %s326_s26 = int_to_ptr.vmem [resolvable:$true] %s325_s26  ;;  %s328_s29 = int_to_ptr.hbm [resolvable:$true] %s327_s29 }
   0x6   :  { %s438_s30 = smov 128   ;;  %s439_s5 = smov 16  }
   0x7   :  { %s440_s4 = smov [#allocation2]   ;;  %s314_s9 = sshll.u32 %s528_s3, 4  ;;  %s315_s9 = int_to_ptr.hbm [resolvable:$true] %s314_s9 }
   0x8   :  { %s312_s6 = sshll.u32 %s440_s4, 4  ;;  %s313_s6 = int_to_ptr.vmem [resolvable:$true] %s312_s6 }
   0xc   :  { %172 = vrot.lane.b32.xlu1 %v22_v4, %s434_s1 }
  0x76   :  { %v171_v8 = vpop.permute.xlu1 %170 }
  0x7e   :  { %v173_v11 = vpop.permute.xlu1 %172 }
  0x80   :  { %v50_v5 = vpop.f32.mrf.mxu1  ;;  %v47_v6 = vpop.f32.mrf.mxu0 }
  0x81   :  { %176 = vrot.lane.b32.xlu0 %v50_v5, %s435_s2  ;;  %74 = vmatpush.msrb.mxu1 %v50_v5 }
  0x82   :  { %348 = vmatpush.xpose.msk.msra.mxu2 %vm23_vm0, %v50_v5 }
  0x83   :  { %75 = vmatpush.msrb.mxu1 %v47_v6 }
  0x84   :  { %346 = vmatmul.msk.f32.vlgmr.msrb.gmra.mxu1 %vm53_vm1, %v21_v3 }
  0x86   :  { %349 = vmatpush.xpose.msk.msra.mxu2 %vm23_vm0, %v47_v6 }
  0x89   :  { %174 = vrot.lane.b32.xlu0 %v47_v6, %s435_s2 }
  0x8c   :  { %347 = vmatmul.msk.f32.gmra.mxu1 %vm53_vm1, %v22_v4 }
  0xf3   :  { %v177_v7 = vpop.permute.xlu0 %176 }
  0xf4   :  { %198 = vmatpush.msra.mxu3 %v177_v7  ;;  %354 = vmatpush.xpose.msk.msrb.mxu0 %vm23_vm0, %v177_v7 }
  0xfb   :  { %v175_v9 = vpop.permute.xlu0 %174 }
  0xfc   :  { %199 = vmatpush.msra.mxu3 %v175_v9  ;;  %355 = vmatpush.xpose.msk.msrb.mxu0 %vm23_vm0, %v175_v9 }
  0xfd   :  { %352 = vmatmul.msk.f32.vlgmr.msra.gmra.mxu3 %vm53_vm1, %v171_v8 }
 0x101   :  { %v77_v10 = vpop.f32.mrf.mxu1 }
 0x102   :  { %v83_v12 = vsel %vm23_vm0, %v77_v10, -inf }
 0x103   :  { %84 = vmax.xlane.f32.xlu0 %v83_v12 }
 0x105   :  { %353 = vmatmul.msk.f32.gmra.mxu3 %vm53_vm1, %v173_v11 }
 0x109   :  { %v80_v13 = vpop.f32.mrf.mxu1 }
 0x10a   :  { %v86_v14 = vsel %vm23_vm0, %v80_v13, -inf }
 0x10b   :  { %87 = vmax.xlane.f32.xlu1 %v86_v14 }
 0x176   :  { %v85_v22 = vpop.xlane.xlu0 %84 }
 0x177   :  { %v89_v26 = vsub.f32 %v77_v10, %v85_v22 }
 0x179   :  { %v91_v29 = vmul.f32 1.442695, %v89_v26 }
 0x17e   :  { %v88_v30 = vpop.xlane.xlu1 %87 }
 0x17f   :  { %v90_v32 = vsub.f32 %v80_v13, %v88_v30 }
 0x180   :  { %v201_v15 = vpop.f32.mrf.mxu3 }
 0x181   :  { %v207_v16 = vsel %vm23_vm0, %v201_v15, -inf  ;;  %v93_v34 = vmul.f32 1.442695, %v90_v32 }
 0x182   :  { %208 = vmax.xlane.f32.xlu2 %v207_v16 }
 0x188   :  { %v204_v17 = vpop.f32.mrf.mxu3 }
 0x189   :  { %v210_v18 = vsel %vm23_vm0, %v204_v17, -inf }
 0x18a   :  { %211 = vmax.xlane.f32.xlu2 %v210_v18 }
 0x1f5   :  { %v209_v19 = vpop.xlane.xlu2 %208 }
 0x1f6   :  { %v213_v20 = vsub.f32 %v201_v15, %v209_v19 }
 0x1f8   :  { %v215_v21 = vmul.f32 1.442695, %v213_v20 }
 0x1fa   :  { %366 = vpow2.f32 %v215_v21 }
 0x1fd   :  { %v212_v23 = vpop.xlane.xlu2 %211 }
 0x1fe   :  { %v214_v24 = vsub.f32 %v204_v17, %v212_v23 }
 0x200   :  { %v367_v25 = vpop.eup %366  ;;  %v217_v27 = vmul.f32 1.442695, %v214_v24 }
 0x201   :  { %v219_v28 = vsel %vm23_vm0, %v367_v25, 0.0 }
 0x202   :  { %368 = vpow2.f32 %v217_v27  ;;  %220 = vadd.xlane.f32.xlu2 %v219_v28 }
 0x203   :  { %370 = vpow2.f32 %v91_v29 }
 0x204   :  { %372 = vpow2.f32 %v93_v34 }
 0x208   :  { %v369_v31 = vpop.eup %368 }
 0x209   :  { %v222_v33 = vsel %vm23_vm0, %v369_v31, 0.0  ;;  %v497_v35 = vpop.eup %370 }
 0x20a   :  { %223 = vadd.xlane.f32.xlu2 %v222_v33  ;;  %v95_v36 = vsel %vm23_vm0, %v497_v35, 0.0  ;;  %v501_v37 = vpop.eup %372 }
 0x20b   :  { %v98_v38 = vsel %vm23_vm0, %v501_v37, 0.0 }
 0x212   :  { %96 = vadd.xlane.f32.xlu2 %v95_v36 }
 0x21a   :  { %99 = vadd.xlane.f32.xlu2 %v98_v38 }
 0x275   :  { %v221_v39 = vpop.xlane.xlu2 %220 }
 0x276   :  { %374 = vrcp.f32 %v221_v39  ;;  %v236_v44 = vand.u32 2147483648, %v221_v39  ;;  %v234_v46 = vand.u32 2147483647, %v221_v39  ;;  %vm230_vm3 = vweird.f32 %v221_v39 }
 0x278   :  { %v237_v49 = vor.u32 1.1754944e-38, %v236_v44  ;;  %vm235_vm5 = vcmp.eq.f32.partialorder %v234_v46, 8.507059e+37 }
 0x27c   :  { %v375_v40 = vpop.eup %374 }
 0x27d   :  { %v226_v41 = vmul.f32 %v375_v40, %v221_v39  ;;  %v224_v42 = vpop.xlane.xlu2 %223  ;;  %vm231_vm2 = vweird.f32 %v375_v40 }
 0x27e   :  { %376 = vrcp.f32 %v224_v42  ;;  %vm232_vm4 = vmor %vm230_vm3, %vm231_vm2  ;;  %v251_v56 = vand.u32 2147483648, %v224_v42  ;;  %v249_v58 = vand.u32 2147483647, %v224_v42  ;;  %vm245_vm7 = vweird.f32 %v224_v42 }
 0x27f   :  { %v227_v43 = vsub.f32 1.0, %v226_v41 }
 0x280   :  { %v252_v61 = vor.u32 1.1754944e-38, %v251_v56  ;;  %vm250_vm9 = vcmp.eq.f32.partialorder %v249_v58, 8.507059e+37 }
 0x281   :  { %v228_v45 = vmul.f32 %v375_v40, %v227_v43 }
 0x283   :  { %v229_v47 = vadd.f32 %v375_v40, %v228_v45 }
 0x284   :  { %v377_v48 = vpop.eup %376 }
 0x285   :  { %v241_v50 = vmul.f32 %v377_v48, %v224_v42  ;;  %v97_v51 = vpop.xlane.xlu2 %96  ;;  %v233_v52 = vsel %vm232_vm4, %v375_v40, %v229_v47  ;;  %vm246_vm6 = vweird.f32 %v377_v48  ;;  %vm294_vm4 = vcmask 130112  }
 0x286   :  { %378 = vrcp.f32 %v97_v51  ;;  %v238_v53 = vsel %vm235_vm5, %v237_v49, %v233_v52  ;;  %vm247_vm8 = vmor %vm245_vm7, %vm246_vm6  ;;  %v112_v4 = vand.u32 2147483648, %v97_v51  ;;  %v110_v6 = vand.u32 2147483647, %v97_v51 }
 0x287   :  { %v242_v54 = vsub.f32 1.0, %v241_v50  ;;  %v239_v55 = vmul.f32 %v367_v25, %v238_v53  ;;  %vm106_vm11 = vweird.f32 %v97_v51 }
 0x288   :  { %v113_v9 = vor.u32 1.1754944e-38, %v112_v4  ;;  %vm111_vm13 = vcmp.eq.f32.partialorder %v110_v6, 8.507059e+37 }
 0x289   :  { %v243_v57 = vmul.f32 %v377_v48, %v242_v54  ;;  %356 = vmatmul.msk.f32.vlgmr.msrb.gmra.mxu0 %vm23_vm0, %v239_v55  ;;  %288 = vrot.lane.b32.xlu2 %v239_v55, %s436_s0 }
 0x28b   :  { %v244_v59 = vadd.f32 %v377_v48, %v243_v57 }
 0x28c   :  { %v379_v60 = vpop.eup %378 }
 0x28d   :  { %v102_v62 = vmul.f32 %v379_v60, %v97_v51  ;;  %v100_v63 = vpop.xlane.xlu2 %99  ;;  %v248_v0 = vsel %vm247_vm8, %v377_v48, %v244_v59  ;;  %vm107_vm10 = vweird.f32 %v379_v60 }
 0x28e   :  { %380 = vrcp.f32 %v100_v63  ;;  %v253_v1 = vsel %vm250_vm9, %v252_v61, %v248_v0  ;;  %vm108_vm12 = vmor %vm106_vm11, %vm107_vm10  ;;  %v127_v15 = vand.u32 2147483648, %v100_v63  ;;  %v125_v17 = vand.u32 2147483647, %v100_v63 }
 0x28f   :  { %v103_v2 = vsub.f32 1.0, %v102_v62  ;;  %v254_v3 = vmul.f32 %v369_v31, %v253_v1  ;;  %vm121_vm15 = vweird.f32 %v100_v63 }
 0x290   :  { %v128_v19 = vor.u32 1.1754944e-38, %v127_v15  ;;  %vm126_vm3 = vcmp.eq.f32.partialorder %v125_v17, 8.507059e+37 }
 0x291   :  { %v104_v5 = vmul.f32 %v379_v60, %v103_v2  ;;  %357 = vmatmul.msk.f32.gmra.mxu0 %vm23_vm0, %v254_v3  ;;  %290 = vrot.lane.b32.xlu0 %v254_v3, %s436_s0 }
 0x293   :  { %v105_v7 = vadd.f32 %v379_v60, %v104_v5 }
 0x294   :  { %v381_v8 = vpop.eup %380 }
 0x295   :  { %v117_v10 = vmul.f32 %v381_v8, %v100_v63  ;;  %v109_v11 = vsel %vm108_vm12, %v379_v60, %v105_v7  ;;  %vm122_vm14 = vweird.f32 %v381_v8 }
 0x296   :  { %v114_v12 = vsel %vm111_vm13, %v113_v9, %v109_v11  ;;  %vm123_vm2 = vmor %vm121_vm15, %vm122_vm14 }
 0x297   :  { %v118_v13 = vsub.f32 1.0, %v117_v10  ;;  %v115_v14 = vmul.f32 %v497_v35, %v114_v12 }
 0x299   :  { %v119_v16 = vmul.f32 %v381_v8, %v118_v13  ;;  %350 = vmatmul.msk.f32.vlgmr.msra.gmra.mxu2 %vm23_vm0, %v115_v14  ;;  %166 = vst.msk [vmem:[#allocation4] sm:$0xff] %vm23_vm0, %v115_v14 }
 0x29b   :  { %v120_v18 = vadd.f32 %v381_v8, %v119_v16 }
 0x29d   :  { %v124_v20 = vsel %vm123_vm2, %v381_v8, %v120_v18 }
 0x29e   :  { %v129_v21 = vsel %vm126_vm3, %v128_v19, %v124_v20 }
 0x29f   :  { %v130_v22 = vmul.f32 %v501_v37, %v129_v21 }
 0x2a1   :  { %351 = vmatmul.msk.f32.gmra.mxu2 %vm23_vm0, %v130_v22  ;;  %167 = vst.msk [vmem:[#allocation4 + $0x8] sm:$0xff] %vm23_vm0, %v130_v22  ;;  %vm305_vm0 = vcmask 261248  }
 0x2e3   :  { %v289_v23 = vpop.permute.xlu2 %288 }
 0x2e4   :  { %295 = vst.msk [vmem:[#allocation4] sm:$0xff] %vm294_vm4, %v289_v23 }
 0x303   :  { %v291_v24 = vpop.permute.xlu0 %290 }
 0x304   :  { %296 = vst.msk [vmem:[#allocation4 + $0x8] sm:$0xff] %vm294_vm4, %v291_v24 }
 0x305   :  { %333 = dma.vmem_to_hbm [thread:$0]  %s326_s26, 256, %s328_s29, [#allocation5], %s438_s30, %s438_s30, %s436_s0  }
 0x306   :  { %v282_v25 = vpop.f32.mrf.mxu0 }
 0x307   :  { %299 = vrot.lane.b32.xlu1 %v282_v25, %s439_s5 }
 0x30e   :  { %v285_v26 = vpop.f32.mrf.mxu0 }
 0x30f   :  { %301 = vrot.lane.b32.xlu2 %v285_v26, %s439_s5 }
 0x31c   :  { %v160_v27 = vpop.f32.mrf.mxu2 }
 0x31d   :  { %168 = vst.msk [vmem:[#allocation2] sm:$0xff] %vm53_vm1, %v160_v27 }
 0x324   :  { %v163_v28 = vpop.f32.mrf.mxu2 }
 0x325   :  { %169 = vst.msk [vmem:[#allocation2 + $0x8] sm:$0xff] %vm53_vm1, %v163_v28 }
 0x369   :  { %v302_v29 = vpop.permute.xlu2 %301 }
 0x36a   :  { %307 = vst.msk [vmem:[#allocation2 + $0x8] sm:$0xff] %vm305_vm0, %v302_v29 }
 0x379   :  { %v300_v30 = vpop.permute.xlu1 %299 }
 0x37a   :  { %306 = vst.msk [vmem:[#allocation2] sm:$0xff] %vm305_vm0, %v300_v30 }
 0x37b   :  { %320 = dma.vmem_to_hbm [thread:$0]  %s313_s6, 256, %s315_s9, [#allocation3], %s438_s30, %s438_s30, %s436_s0  }
 0x37c   :  { %430 = dma.done.wait [#allocation3], 256  }
 0x37d   :  { %431 = vsyncadd [#allocation3], 4294967040 }
 0x37e   :  { %432 = dma.done.wait [#allocation5], 256  }
 0x37f   :  { %433 = vsyncadd [#allocation5], 4294967040 }
 0x380   :  { %342 = vsyncpa [#allocation3], 1 }
 0x381   :  { %343 = vsyncpa [#allocation5], 1 }

</bundles_post_ra>
